<compile_context>
chip_gen: v5e
topology: v5e:2x2
jax: 0.10.0
libtpu: 0.0.40
codegen_flags: <defaults>
</compile_context>

<pallas_src>
import jax
import jax.numpy as jnp
from jax.experimental import pallas as pl
from jax.experimental.pallas import tpu as pltpu

# ----- loss hyper-parameters (defaults of the PyTorch module) -----------------
FOCAL_ALPHA = 0.01        # BinaryFocalLossVal.alpha
FOCAL_GAMMA = 2.0         # BinaryFocalLossVal.gamma  (== 2 -> implemented as square)
DELTA_A = 0.1             # ComposedHingedLossVal.delta_a
DELTA_R = 1.0             # ComposedHingedLossVal.delta_r
EMB_ALPHA = 1.0           # ComposedHingedLossVal.alpha
EMB_BETA = 1.0            # ComposedHingedLossVal.beta
EMB_GAMMA = 0.001         # ComposedHingedLossVal.gamma

_MXU_MIN_E = 16           # feed the (K,E)x(E,T) pixel-distance cross term to the MXU
_MXU_MIN_K = 16           #   once operands are big enough (sized for v5e's 128x128 tile)
_GRAM_MIN_K = 8           # vectorized K x K repelling once an unrolled loop would bloat


def _vmem_limit_bytes():
    """Scoped-VMEM limit per generation: ~75% of physical (96 MiB on 128 MiB
    v5e/v6e, 48 MiB on 64 MiB v7x); conservative 48 MiB if the query fails."""
    cap = 64 * 1024 * 1024
    try:
        cap = int(pltpu.get_tpu_info().vmem_capacity_bytes)
    except Exception:
        pass
    return max(32 * 1024 * 1024, min(int(cap * 0.75), 96 * 1024 * 1024))


def _pick_tile(hw, c, e, vmem_limit):
    """Largest lane tile (multiple of 128) dividing HW whose double-buffered
    working set stays well inside the scoped-VMEM limit."""
    pad8 = lambda n: -(-max(n, 1) // 8) * 8
    # f32-equivalent bytes per lane across all double-buffered input blocks:
    # logits pad8(C), sem target 8, two dense focal streams 2, emb pad8(E), inst 8.
    bytes_per_lane = 2 * 4 * (pad8(c) + 8 + 2 + pad8(e) + 8)
    cap = min(max(128, (vmem_limit // 2) // bytes_per_lane), 16384)
    best = None
    t = 128
    while t <= min(cap, hw):
        if hw % t == 0:
            best = t
        t += 128
    if best is not None:
        return best
    # HW < 128 or not 128-divisible: one tile per image.
    # TODO(synk): pad the pixel axis instead when C*HW*f32 would overflow v7x VMEM.
    return hw


# ============================ fused Pallas kernel ==============================

def _panoptic_kernel(x_ref, t_ref, w_ref, o_ref, ct_ref, emb_ref, inst_ref,
                     ce_ref, cid_ref,
                     sem_ref, cnt_ref, foc_ref, embout_ref,
                     sem_acc, cnt_acc, foc_acc, attr_acc, pcnt_acc):
    # x:    (1, C, T)      semantic logits  (classes on sublanes, pixels on lanes)
    # t:    (1, 1, T)      int32 semantic labels
    # w:    (C, 1)         f32 class weights
    # o,ct: (1, R, 128)    center heatmap / target (sublane-dense) or (1, 1, T)
    # emb:  (1, E, T)      embeddings
    # inst: (1, 1, T)      int32 instance ids
    # ce:   (1, K, E)      center embeddings (resident across HW tiles)
    # cid:  (1, K, 1)      int32 instance id at each center
    hw = pl.program_id(2)
    n_hw = pl.num_programs(2)

    @pl.when(hw == 0)
    def _():
        sem_acc[...] = jnp.zeros_like(sem_acc)
        cnt_acc[...] = jnp.zeros_like(cnt_acc)
        foc_acc[...] = jnp.zeros_like(foc_acc)
        attr_acc[...] = jnp.zeros_like(attr_acc)
        pcnt_acc[...] = jnp.zeros_like(pcnt_acc)

    # ---------------- semantic cross-entropy ----------------------------------
    x = x_ref[0].astype(jnp.float32)                          # (C, T)
    t = t_ref[0]                                              # (1, T) int32
    w = w_ref[...]                                            # (C, 1) f32
    C, T = x.shape
    cls = jax.lax.broadcasted_iota(jnp.int32, (C, T), 0)
    hit = cls == t                                            # bool mask, no f32 one-hot
    mx = jnp.max(x, axis=0, keepdims=True)                                    # (1, T)
    lse = mx + jnp.log(jnp.sum(jnp.exp(x - mx), axis=0, keepdims=True))       # (1, T)
    xt = jnp.sum(jnp.where(hit, x, 0.0), axis=0, keepdims=True)               # logit @ target
    wt = jnp.sum(jnp.where(hit, w, 0.0), axis=0, keepdims=True)               # weight @ target
    sem_acc[...] += jnp.sum(wt * (lse - xt), axis=1, keepdims=True)           # (1, 1)
    cnt_acc[...] += jnp.sum(hit.astype(jnp.float32), axis=1, keepdims=True)   # (C, 1)

    # ---------------- binary focal loss (sublane-dense tile) ------------------
    o = o_ref[0].astype(jnp.float32)                          # (R, 128) or (1, T)
    pos = ct_ref[0] != 0
    p = jnp.where(pos, o, 1.0 - o)
    a = jnp.where(pos, FOCAL_ALPHA, 1.0 - FOCAL_ALPHA)
    foc = -a * jnp.square(1.0 - p) * jnp.log(jnp.maximum(p, 1e-4))   # gamma == 2 -> square
    foc_acc[...] += jnp.sum(jnp.sum(foc, axis=1, keepdims=True), axis=0, keepdims=True)

    # ---------------- hinged embedding attraction -----------------------------
    emb = emb_ref[0].astype(jnp.float32)                      # (E, T)
    inst = inst_ref[0]                                        # (1, T) int32
    ce = ce_ref[0].astype(jnp.float32)                        # (K, E)
    cid = cid_ref[0]                                          # (K, 1) int32
    E = emb.shape[0]
    K = ce.shape[0]

    if E >= _MXU_MIN_E and K >= _MXU_MIN_K:
        # big operands -> MXU cross term; feed native (possibly bf16) operands.
        ce2 = jnp.sum(ce * ce, axis=1, keepdims=True)                         # (K, 1)
        e2 = jnp.sum(emb * emb, axis=0, keepdims=True)                        # (1, T)
        cross = jnp.dot(ce_ref[0], emb_ref[0],
                        preferred_element_type=jnp.float32)                   # (K, T)
        d2 = jnp.maximum(ce2 + e2 - 2.0 * cross, 0.0)
    else:
        # tiny E/K -> VPU broadcast-FMA distance (no point waking the MXU)
        diff = ce[:, 0:1] - emb[0:1, :]
        d2 = diff * diff
        for e_i in range(1, E):
            diff = ce[:, e_i:e_i + 1] - emb[e_i:e_i + 1, :]
            d2 = d2 + diff * diff
    dist = jnp.sqrt(d2)                                                       # (K, T)
    hinged = jnp.maximum(dist - DELTA_A, 0.0)
    match = cid == inst                                                       # (K, T) bool
    attr_acc[...] += jnp.sum(jnp.where(match, hinged, 0.0), axis=1, keepdims=True)
    pcnt_acc[...] += jnp.sum(match.astype(jnp.float32), axis=1, keepdims=True)

    # ---------------- finalize (once per (batch item, core-slice)) ------------
    @pl.when(hw == n_hw - 1)
    def _():
        sem_ref[0] = sem_acc[...]
        cnt_ref[0] = cnt_acc[...]
        foc_ref[0] = foc_acc[...]

        # per-center repelling + regularization (K x K work, once per batch item)
        if K >= _GRAM_MIN_K:
            gram = jax.lax.dot_general(ce, ce, (((1,), (1,)), ((), ())),
                                       preferred_element_type=jnp.float32)   # (K, K)
            eye = (jax.lax.broadcasted_iota(jnp.int32, (K, K), 0) ==
                   jax.lax.broadcasted_iota(jnp.int32, (K, K), 1))
            diag = jnp.where(eye, gram, 0.0)
            dcol = jnp.sum(diag, axis=1, keepdims=True)                       # (K, 1)
            drow = jnp.sum(diag, axis=0, keepdims=True)                       # (1, K)
            d2kk = jnp.maximum(dcol + drow - 2.0 * gram, 0.0)                 # exact 0 diagonal
            rep_pc = (jnp.sum(jnp.maximum(DELTA_R - jnp.sqrt(d2kk), 0.0),
                              axis=1, keepdims=True) - DELTA_R)               # self term removed
        else:
            rep_sum = jnp.zeros((K, 1), jnp.float32)
            for j in range(K):                              # tiny K: short unrolled VPU loop
                dj = ce - ce[j:j + 1, :]
                dj = jnp.sqrt(jnp.sum(dj * dj, axis=1, keepdims=True))
                rep_sum = rep_sum + jnp.maximum(DELTA_R - dj, 0.0)
            rep_pc = rep_sum - DELTA_R
        reg_pc = jnp.sqrt(jnp.sum(ce * ce, axis=1, keepdims=True))            # (K, 1)

        # single packed, lane-dense store: [attraction, count, repelling, regularization]
        lane = jax.lax.broadcasted_iota(jnp.int32, (K, 4), 1)
        embout_ref[0] = (jnp.where(lane == 0, attr_acc[...], 0.0) +
                         jnp.where(lane == 1, pcnt_acc[...], 0.0) +
                         jnp.where(lane == 2, rep_pc, 0.0) +
                         jnp.where(lane == 3, reg_pc, 0.0))


# ============================ wrapper (glue) ===================================

def panoptic_loss_val(output, semantic_target, center_target, instance_target,
                      center_coordinates, weighting):
    """PanopticLossVal.forward"""
    semantic_output, center_output, embedding_output = output
    weight = jnp.asarray(weighting, jnp.float32)

    N, C, H, W = semantic_output.shape
    E = embedding_output.shape[1]
    K = center_coordinates.shape[1]
    HW = H * W

    vmem_limit = _vmem_limit_bytes()
    T = _pick_tile(HW, C, E, vmem_limit)
    n_tiles = HW // T
    S = 2 if (n_tiles >= 2 and n_tiles % 2 == 0) else 1      # HW split across v7x TCs
    n_h = n_tiles // S

    # semantic CE operands: classes on sublanes, pixels on lanes, native dtype
    x = semantic_output.reshape(N, C, HW)
    st = semantic_target[0].reshape(N, 1, HW).astype(jnp.int32)
    w = weight.reshape(C, 1)

    # focal operands: sublane-dense rows of 128 lanes whenever the tiling allows it
    dense_foc = (HW % 128 == 0) and (T % 1024 == 0 or T == HW)
    if dense_foc:
        o = center_output.reshape(N, HW // 128, 128)
        ct = center_target.reshape(N, HW // 128, 128)
        foc_block = (1, T // 128, 128)
        foc_map = lambda b, s, h: (b, s * n_h + h, 0)
    else:
        o = center_output.reshape(N, 1, HW)
        ct = center_target.reshape(N, 1, HW)
        foc_block = (1, 1, T)
        foc_map = lambda b, s, h: (b, 0, s * n_h + h)

    # embedding operands + tiny host-side gather of the K center embeddings / ids
    emb = embedding_output.reshape(N, E, HW)
    inst = instance_target.reshape(N, 1, HW).astype(jnp.int32)
    flat = (center_coordinates[..., 0] * W + center_coordinates[..., 1]).astype(jnp.int32)
    ce_ek = jnp.take_along_axis(emb, flat[:, None, :], axis=2)                # (N, E, K)
    ce_ke = jnp.transpose(ce_ek, (0, 2, 1))                                   # (N, K, E) native
    cid = jnp.take_along_axis(inst[:, 0, :], flat, axis=1)[:, :, None]        # (N, K, 1)

    hw_map = lambda b, s, h: (b, 0, s * n_h + h)
    per_bs = lambda b, s, h: (b * S + s, 0, 0)

    sem_part, cnt_part, foc_part, emb_part = pl.pallas_call(
        _panoptic_kernel,
        out_shape=(jax.ShapeDtypeStruct((N * S, 1, 1), jnp.float32),
                   jax.ShapeDtypeStruct((N * S, C, 1), jnp.float32),
                   jax.ShapeDtypeStruct((N * S, 1, 1), jnp.float32),
                   jax.ShapeDtypeStruct((N * S, K, 4), jnp.float32)),
        grid=(N, S, n_h),
        in_specs=[pl.BlockSpec((1, C, T), hw_map),
                  pl.BlockSpec((1, 1, T), hw_map),
                  pl.BlockSpec((C, 1), lambda b, s, h: (0, 0)),
                  pl.BlockSpec(foc_block, foc_map),
                  pl.BlockSpec(foc_block, foc_map),
                  pl.BlockSpec((1, E, T), hw_map),
                  pl.BlockSpec((1, 1, T), hw_map),
                  pl.BlockSpec((1, K, E), lambda b, s, h: (b, 0, 0)),
                  pl.BlockSpec((1, K, 1), lambda b, s, h: (b, 0, 0))],
        out_specs=(pl.BlockSpec((1, 1, 1), per_bs),
                   pl.BlockSpec((1, C, 1), per_bs),
                   pl.BlockSpec((1, 1, 1), per_bs),
                   pl.BlockSpec((1, K, 4), per_bs)),
        scratch_shapes=[pltpu.VMEM((1, 1), jnp.float32),
                        pltpu.VMEM((C, 1), jnp.float32),
                        pltpu.VMEM((1, 1), jnp.float32),
                        pltpu.VMEM((K, 1), jnp.float32),
                        pltpu.VMEM((K, 1), jnp.float32)],
        compiler_params=pltpu.CompilerParams(
            dimension_semantics=("parallel", "parallel", "arbitrary"),
            vmem_limit_bytes=vmem_limit),
    )(x, st, w, o, ct, emb, inst, ce_ke, cid)

    # ---- semantic CE reduction (matches CrossEntropyLoss2dVal) ---------------
    counts = jnp.sum(cnt_part[:, :, 0], axis=0)                               # (C,)
    divisor = jnp.maximum(jnp.sum(counts * weight), 1e-5)
    sem_loss = jnp.sum(sem_part) / divisor
    n_pix_per_class = counts.astype(jnp.int32)

    # ---- focal reduction -------------------------------------------------------
    cen_loss = jnp.sum(foc_part)

    # ---- composed hinged embedding loss ---------------------------------------
    emb4 = emb_part.reshape(N, S, K, 4)
    attr = jnp.sum(emb4[..., 0], axis=1)                                      # (N, K)
    cnt = jnp.sum(emb4[..., 1], axis=1)                                       # (N, K)
    rep = emb4[:, 0, :, 2]                                                    # (N, K) same per s
    reg = emb4[:, 0, :, 3]                                                    # (N, K)

    # reference: n = #pixels of the center's instance; "if n > 1: n -= 1"
    n_adj = jnp.where(cnt > 1.0, cnt - 1.0, cnt)
    n_safe = jnp.maximum(n_adj, 1.0)
    per_item_attr = jnp.sum(attr / n_safe, axis=1)                            # (N,)
    per_item_reg = jnp.sum(reg, axis=1)
    per_item_rep = jnp.sum(rep, axis=1)

    # closed form of the reference's running division: item i's contribution is
    # divided by K (resp. K*(K-1)) once for itself and once per later batch item.
    idx = jnp.arange(N, dtype=jnp.float32)
    if K >= 1:
        wk = jnp.float32(K) ** (idx - N)
        attraction = jnp.sum(wk * per_item_attr)
        regularization = jnp.sum(wk * per_item_reg)
    else:
        attraction = jnp.float32(0.0)
        regularization = jnp.float32(0.0)
    if K > 1:
        wr = jnp.float32(K * (K - 1)) ** (idx - N)
        repelling = jnp.sum(wr * per_item_rep)
    else:
        repelling = jnp.float32(0.0)

    emb_loss = EMB_ALPHA * attraction + EMB_BETA * repelling + EMB_GAMMA * regularization

    return (cen_loss, sem_loss, emb_loss, attraction, repelling,
            n_pix_per_class, divisor)


# ============================ demo / smoke test ================================

if __name__ == "__main__":
    N, C, H, W = 2, 5, 16, 16      # batch, semantic classes, spatial
    E, K = 4, 3                    # embedding dim, centers per image
    weighting = [1.0, 2.0, 0.5, 1.5, 1.0]

    key = jax.random.PRNGKey(0)
    k1, k2, k3, k4, k5, k6, k7, k8 = jax.random.split(key, 8)

    semantic_output = jax.random.normal(k1, (N, C, H, W), jnp.float32)
    center_output = jax.nn.sigmoid(jax.random.normal(k2, (N, 1, H, W), jnp.float32))
    embedding_output = jax.random.normal(k3, (N, E, H, W), jnp.float32)

    sem_tgt = jax.random.randint(k4, (N, H, W), 0, C).astype(jnp.int32)
    semantic_target = sem_tgt[None]                      # module indexes semantic_target[0]
    center_target = jax.random.bernoulli(k5, 0.05, (N, 1, H, W)).astype(jnp.float32)
    instance_target = jax.random.randint(k6, (N, H, W), 0, 5).astype(jnp.int32)
    ys = jax.random.randint(k7, (N, K), 0, H)
    xs = jax.random.randint(k8, (N, K), 0, W)
    center_coordinates = jnp.stack([ys, xs], axis=-1).astype(jnp.int32)   # (N, K, 2)

    results = panoptic_loss_val(
        (semantic_output, center_output, embedding_output),
        semantic_target, center_target, instance_target,
        center_coordinates, weighting)

    jax.block_until_ready(results)
    print("KERNEL_OK")
</pallas_src>

<mosaic_0001>
module attributes {stable_mosaic.version = 11 : i64} {
  func.func @_panoptic_kernel(%arg0: i32, %arg1: i32, %arg2: i32, %arg3: memref<1x5x256xf32, #tpu.memory_space<vmem>>, %arg4: memref<1x1x256xi32, #tpu.memory_space<vmem>>, %arg5: memref<5x1xf32, #tpu.memory_space<vmem>>, %arg6: memref<1x2x128xf32, #tpu.memory_space<vmem>>, %arg7: memref<1x2x128xf32, #tpu.memory_space<vmem>>, %arg8: memref<1x4x256xf32, #tpu.memory_space<vmem>>, %arg9: memref<1x1x256xi32, #tpu.memory_space<vmem>>, %arg10: memref<1x3x4xf32, #tpu.memory_space<vmem>>, %arg11: memref<1x3x1xi32, #tpu.memory_space<vmem>>, %arg12: memref<1x1x1xf32, #tpu.memory_space<vmem>>, %arg13: memref<1x5x1xf32, #tpu.memory_space<vmem>>, %arg14: memref<1x1x1xf32, #tpu.memory_space<vmem>>, %arg15: memref<1x3x4xf32, #tpu.memory_space<vmem>>, %arg16: memref<1x1xf32, #tpu.memory_space<vmem>>, %arg17: memref<5x1xf32, #tpu.memory_space<vmem>>, %arg18: memref<1x1xf32, #tpu.memory_space<vmem>>, %arg19: memref<3x1xf32, #tpu.memory_space<vmem>>, %arg20: memref<3x1xf32, #tpu.memory_space<vmem>>) attributes {dimension_semantics = [#tpu.dimension_semantics<parallel>, #tpu.dimension_semantics<parallel>, #tpu.dimension_semantics<arbitrary>], iteration_bounds = array<i64: 2, 1, 1>, scalar_prefetch = 0 : i64, scratch_operands = 5 : i64, tpu.core_type = #tpu.core_type<tc>, window_params = [{transform_indices = @transform_0, window_bounds = array<i64: 1, 5, 256>}, {transform_indices = @transform_1, window_bounds = array<i64: 1, 1, 256>}, {pipeline_mode = #tpu.pipeline_mode<synchronous>, transform_indices = @transform_2, window_bounds = array<i64: 5, 1>}, {transform_indices = @transform_3, window_bounds = array<i64: 1, 2, 128>}, {transform_indices = @transform_4, window_bounds = array<i64: 1, 2, 128>}, {transform_indices = @transform_5, window_bounds = array<i64: 1, 4, 256>}, {transform_indices = @transform_6, window_bounds = array<i64: 1, 1, 256>}, {transform_indices = @transform_7, window_bounds = array<i64: 1, 3, 4>}, {transform_indices = @transform_8, window_bounds = array<i64: 1, 3, 1>}, {transform_indices = @transform_9, window_bounds = array<i64: 1, 1, 1>}, {transform_indices = @transform_10, window_bounds = array<i64: 1, 5, 1>}, {transform_indices = @transform_11, window_bounds = array<i64: 1, 1, 1>}, {transform_indices = @transform_12, window_bounds = array<i64: 1, 3, 4>}]} {
    %c0_i32 = arith.constant 0 : i32
    %0 = arith.cmpi eq, %arg2, %c0_i32 : i32
    %1 = arith.extui %0 : i1 to i32
    %c0_i32_0 = arith.constant 0 : i32
    %2 = arith.cmpi ne, %1, %c0_i32_0 : i32
    scf.if %2 {
      %cst_69 = arith.constant 0.000000e+00 : f32
      %133 = vector.broadcast %cst_69 : f32 to vector<1x1xf32>
      %c0_70 = arith.constant 0 : index
      %c0_71 = arith.constant 0 : index
      %134 = vector.load %arg16[%c0_70, %c0_71] : memref<1x1xf32, #tpu.memory_space<vmem>>, vector<1x1xf32>
      tpu.vector_store %arg16[%c0_70, %c0_71], %133 {strides = array<i32>} : memref<1x1xf32, #tpu.memory_space<vmem>>, vector<1x1xf32>,
      %cst_72 = arith.constant 0.000000e+00 : f32
      %135 = vector.broadcast %cst_72 : f32 to vector<5x1xf32>
      %c0_73 = arith.constant 0 : index
      %c0_74 = arith.constant 0 : index
      %136 = vector.load %arg17[%c0_73, %c0_74] : memref<5x1xf32, #tpu.memory_space<vmem>>, vector<5x1xf32>
      tpu.vector_store %arg17[%c0_73, %c0_74], %135 {strides = array<i32>} : memref<5x1xf32, #tpu.memory_space<vmem>>, vector<5x1xf32>,
      %cst_75 = arith.constant 0.000000e+00 : f32
      %137 = vector.broadcast %cst_75 : f32 to vector<1x1xf32>
      %c0_76 = arith.constant 0 : index
      %c0_77 = arith.constant 0 : index
      %138 = vector.load %arg18[%c0_76, %c0_77] : memref<1x1xf32, #tpu.memory_space<vmem>>, vector<1x1xf32>
      tpu.vector_store %arg18[%c0_76, %c0_77], %137 {strides = array<i32>} : memref<1x1xf32, #tpu.memory_space<vmem>>, vector<1x1xf32>,
      %cst_78 = arith.constant 0.000000e+00 : f32
      %139 = vector.broadcast %cst_78 : f32 to vector<3x1xf32>
      %c0_79 = arith.constant 0 : index
      %c0_80 = arith.constant 0 : index
      %140 = vector.load %arg19[%c0_79, %c0_80] : memref<3x1xf32, #tpu.memory_space<vmem>>, vector<3x1xf32>
      tpu.vector_store %arg19[%c0_79, %c0_80], %139 {strides = array<i32>} : memref<3x1xf32, #tpu.memory_space<vmem>>, vector<3x1xf32>,
      %cst_81 = arith.constant 0.000000e+00 : f32
      %141 = vector.broadcast %cst_81 : f32 to vector<3x1xf32>
      %c0_82 = arith.constant 0 : index
      %c0_83 = arith.constant 0 : index
      %142 = vector.load %arg20[%c0_82, %c0_83] : memref<3x1xf32, #tpu.memory_space<vmem>>, vector<3x1xf32>
      tpu.vector_store %arg20[%c0_82, %c0_83], %141 {strides = array<i32>} : memref<3x1xf32, #tpu.memory_space<vmem>>, vector<3x1xf32>,
    } else {
    }
    %c0 = arith.constant 0 : index
    %c0_1 = arith.constant 0 : index
    %c0_2 = arith.constant 0 : index
    %3 = vector.load %arg3[%c0, %c0_1, %c0_2] : memref<1x5x256xf32, #tpu.memory_space<vmem>>, vector<1x5x256xf32>
    %4 = vector.shape_cast %3 : vector<1x5x256xf32> to vector<5x256xf32>
    %c0_3 = arith.constant 0 : index
    %c0_4 = arith.constant 0 : index
    %c0_5 = arith.constant 0 : index
    %5 = vector.load %arg4[%c0_3, %c0_4, %c0_5] : memref<1x1x256xi32, #tpu.memory_space<vmem>>, vector<1x1x256xi32>
    %6 = vector.shape_cast %5 : vector<1x1x256xi32> to vector<1x256xi32>
    %c0_6 = arith.constant 0 : index
    %c0_7 = arith.constant 0 : index
    %7 = vector.load %arg5[%c0_6, %c0_7] : memref<5x1xf32, #tpu.memory_space<vmem>>, vector<5x1xf32>
    %8 = tpu.iota {dimensions = array<i32: 0>} : vector<5x256xi32>
    %9 = vector.broadcast %6 : vector<1x256xi32> to vector<5x256xi32>
    %10 = arith.cmpi eq, %8, %9 : vector<5x256xi32>
    %cst = arith.constant dense<0xFF800000> : vector<256xf32>
    %11 = vector.multi_reduction <maximumf>, %4, %cst [0] : vector<5x256xf32> to vector<256xf32>
    %12 = vector.shape_cast %11 : vector<256xf32> to vector<1x256xf32>
    %13 = vector.broadcast %12 : vector<1x256xf32> to vector<5x256xf32>
    %14 = arith.subf %4, %13 : vector<5x256xf32>
    %15 = math.exp %14 : vector<5x256xf32>
    %cst_8 = arith.constant dense<0.000000e+00> : vector<256xf32>
    %16 = vector.multi_reduction <add>, %15, %cst_8 [0] : vector<5x256xf32> to vector<256xf32>
    %17 = vector.shape_cast %16 : vector<256xf32> to vector<1x256xf32>
    %18 = math.log %17 : vector<1x256xf32>
    %19 = arith.addf %12, %18 : vector<1x256xf32>
    %cst_9 = arith.constant 0.000000e+00 : f32
    %20 = vector.broadcast %cst_9 : f32 to vector<5x256xf32>
    %21 = arith.select %10, %4, %20 : vector<5x256xi1>, vector<5x256xf32>
    %cst_10 = arith.constant dense<0.000000e+00> : vector<256xf32>
    %22 = vector.multi_reduction <add>, %21, %cst_10 [0] : vector<5x256xf32> to vector<256xf32>
    %23 = vector.shape_cast %22 : vector<256xf32> to vector<1x256xf32>
    %cst_11 = arith.constant 0.000000e+00 : f32
    %24 = vector.shape_cast %7 : vector<5x1xf32> to vector<5x1xf32>
    %25 = vector.broadcast %24 : vector<5x1xf32> to vector<5x256xf32>
    %26 = vector.broadcast %cst_11 : f32 to vector<5x256xf32>
    %27 = arith.select %10, %25, %26 : vector<5x256xi1>, vector<5x256xf32>
    %cst_12 = arith.constant dense<0.000000e+00> : vector<256xf32>
    %28 = vector.multi_reduction <add>, %27, %cst_12 [0] : vector<5x256xf32> to vector<256xf32>
    %29 = vector.shape_cast %28 : vector<256xf32> to vector<1x256xf32>
    %c0_13 = arith.constant 0 : index
    %c0_14 = arith.constant 0 : index
    %30 = vector.load %arg16[%c0_13, %c0_14] : memref<1x1xf32, #tpu.memory_space<vmem>>, vector<1x1xf32>
    %31 = arith.subf %19, %23 : vector<1x256xf32>
    %32 = arith.mulf %29, %31 : vector<1x256xf32>
    %cst_15 = arith.constant dense<0.000000e+00> : vector<1xf32>
    %33 = vector.multi_reduction <add>, %32, %cst_15 [1] : vector<1x256xf32> to vector<1xf32>
    %34 = vector.shape_cast %33 : vector<1xf32> to vector<1x1xf32>
    %35 = arith.addf %30, %34 : vector<1x1xf32>
    %c0_16 = arith.constant 0 : index
    %c0_17 = arith.constant 0 : index
    %36 = vector.load %arg16[%c0_16, %c0_17] : memref<1x1xf32, #tpu.memory_space<vmem>>, vector<1x1xf32>
    tpu.vector_store %arg16[%c0_16, %c0_17], %35 {strides = array<i32>} : memref<1x1xf32, #tpu.memory_space<vmem>>, vector<1x1xf32>,
    %c0_18 = arith.constant 0 : index
    %c0_19 = arith.constant 0 : index
    %37 = vector.load %arg17[%c0_18, %c0_19] : memref<5x1xf32, #tpu.memory_space<vmem>>, vector<5x1xf32>
    %38 = arith.extui %10 : vector<5x256xi1> to vector<5x256xi32>
    %39 = arith.sitofp %38 : vector<5x256xi32> to vector<5x256xf32>
    %cst_20 = arith.constant dense<0.000000e+00> : vector<5xf32>
    %40 = vector.multi_reduction <add>, %39, %cst_20 [1] : vector<5x256xf32> to vector<5xf32>
    %41 = vector.shape_cast %40 : vector<5xf32> to vector<5x1xf32>
    %42 = arith.addf %37, %41 : vector<5x1xf32>
    %c0_21 = arith.constant 0 : index
    %c0_22 = arith.constant 0 : index
    %43 = vector.load %arg17[%c0_21, %c0_22] : memref<5x1xf32, #tpu.memory_space<vmem>>, vector<5x1xf32>
    tpu.vector_store %arg17[%c0_21, %c0_22], %42 {strides = array<i32>} : memref<5x1xf32, #tpu.memory_space<vmem>>, vector<5x1xf32>,
    %c0_23 = arith.constant 0 : index
    %c0_24 = arith.constant 0 : index
    %c0_25 = arith.constant 0 : index
    %44 = vector.load %arg6[%c0_23, %c0_24, %c0_25] : memref<1x2x128xf32, #tpu.memory_space<vmem>>, vector<1x2x128xf32>
    %45 = vector.shape_cast %44 : vector<1x2x128xf32> to vector<2x128xf32>
    %c0_26 = arith.constant 0 : index
    %c0_27 = arith.constant 0 : index
    %c0_28 = arith.constant 0 : index
    %46 = vector.load %arg7[%c0_26, %c0_27, %c0_28] : memref<1x2x128xf32, #tpu.memory_space<vmem>>, vector<1x2x128xf32>
    %47 = vector.shape_cast %46 : vector<1x2x128xf32> to vector<2x128xf32>
    %cst_29 = arith.constant 0.000000e+00 : f32
    %48 = vector.broadcast %cst_29 : f32 to vector<2x128xf32>
    %49 = arith.cmpf one, %47, %48 : vector<2x128xf32>
    %cst_30 = arith.constant 1.000000e+00 : f32
    %50 = vector.broadcast %cst_30 : f32 to vector<2x128xf32>
    %51 = arith.subf %50, %45 : vector<2x128xf32>
    %52 = arith.select %49, %45, %51 : vector<2x128xi1>, vector<2x128xf32>
    %cst_31 = arith.constant 0.00999999977 : f32
    %cst_32 = arith.constant 9.900000e-01 : f32
    %53 = vector.broadcast %cst_31 : f32 to vector<2x128xf32>
    %54 = vector.broadcast %cst_32 : f32 to vector<2x128xf32>
    %55 = arith.select %49, %53, %54 : vector<2x128xi1>, vector<2x128xf32>
    %cst_33 = arith.constant 0.000000e+00 : f32
    %56 = vector.broadcast %cst_33 : f32 to vector<2x128xf32>
    %57 = arith.subf %56, %55 : vector<2x128xf32>
    %cst_34 = arith.constant 1.000000e+00 : f32
    %58 = vector.broadcast %cst_34 : f32 to vector<2x128xf32>
    %59 = arith.subf %58, %52 : vector<2x128xf32>
    %60 = arith.mulf %59, %59 : vector<2x128xf32>
    %61 = arith.mulf %57, %60 : vector<2x128xf32>
    %cst_35 = arith.constant 9.99999974E-5 : f32
    %62 = vector.broadcast %cst_35 : f32 to vector<2x128xf32>
    %63 = arith.maximumf %52, %62 : vector<2x128xf32>
    %64 = math.log %63 : vector<2x128xf32>
    %65 = arith.mulf %61, %64 : vector<2x128xf32>
    %c0_36 = arith.constant 0 : index
    %c0_37 = arith.constant 0 : index
    %66 = vector.load %arg18[%c0_36, %c0_37] : memref<1x1xf32, #tpu.memory_space<vmem>>, vector<1x1xf32>
    %cst_38 = arith.constant dense<0.000000e+00> : vector<2xf32>
    %67 = vector.multi_reduction <add>, %65, %cst_38 [1] : vector<2x128xf32> to vector<2xf32>
    %68 = vector.shape_cast %67 : vector<2xf32> to vector<2x1xf32>
    %cst_39 = arith.constant dense<0.000000e+00> : vector<1xf32>
    %69 = vector.multi_reduction <add>, %68, %cst_39 [0] : vector<2x1xf32> to vector<1xf32>
    %70 = vector.shape_cast %69 : vector<1xf32> to vector<1x1xf32>
    %71 = arith.addf %66, %70 : vector<1x1xf32>
    %c0_40 = arith.constant 0 : index
    %c0_41 = arith.constant 0 : index
    %72 = vector.load %arg18[%c0_40, %c0_41] : memref<1x1xf32, #tpu.memory_space<vmem>>, vector<1x1xf32>
    tpu.vector_store %arg18[%c0_40, %c0_41], %71 {strides = array<i32>} : memref<1x1xf32, #tpu.memory_space<vmem>>, vector<1x1xf32>,
    %c0_42 = arith.constant 0 : index
    %c0_43 = arith.constant 0 : index
    %c0_44 = arith.constant 0 : index
    %73 = vector.load %arg8[%c0_42, %c0_43, %c0_44] : memref<1x4x256xf32, #tpu.memory_space<vmem>>, vector<1x4x256xf32>
    %74 = vector.shape_cast %73 : vector<1x4x256xf32> to vector<4x256xf32>
    %c0_45 = arith.constant 0 : index
    %c0_46 = arith.constant 0 : index
    %c0_47 = arith.constant 0 : index
    %75 = vector.load %arg9[%c0_45, %c0_46, %c0_47] : memref<1x1x256xi32, #tpu.memory_space<vmem>>, vector<1x1x256xi32>
    %76 = vector.shape_cast %75 : vector<1x1x256xi32> to vector<1x256xi32>
    %c0_48 = arith.constant 0 : index
    %c0_49 = arith.constant 0 : index
    %c0_50 = arith.constant 0 : index
    %77 = vector.load %arg10[%c0_48, %c0_49, %c0_50] : memref<1x3x4xf32, #tpu.memory_space<vmem>>, vector<1x3x4xf32>
    %78 = vector.shape_cast %77 : vector<1x3x4xf32> to vector<3x4xf32>
    %c0_51 = arith.constant 0 : index
    %c0_52 = arith.constant 0 : index
    %c0_53 = arith.constant 0 : index
    %79 = vector.load %arg11[%c0_51, %c0_52, %c0_53] : memref<1x3x1xi32, #tpu.memory_space<vmem>>, vector<1x3x1xi32>
    %80 = vector.shape_cast %79 : vector<1x3x1xi32> to vector<3x1xi32>
    %81 = vector.extract_strided_slice %78 {offsets = [0, 0], sizes = [3, 1], strides = [1, 1]} : vector<3x4xf32> to vector<3x1xf32>
    %82 = vector.extract_strided_slice %74 {offsets = [0, 0], sizes = [1, 256], strides = [1, 1]} : vector<4x256xf32> to vector<1x256xf32>
    %83 = vector.broadcast %81 : vector<3x1xf32> to vector<3x256xf32>
    %84 = vector.broadcast %82 : vector<1x256xf32> to vector<3x256xf32>
    %85 = arith.subf %83, %84 : vector<3x256xf32>
    %86 = arith.mulf %85, %85 : vector<3x256xf32>
    %87 = vector.extract_strided_slice %78 {offsets = [0, 1], sizes = [3, 1], strides = [1, 1]} : vector<3x4xf32> to vector<3x1xf32>
    %88 = vector.extract_strided_slice %74 {offsets = [1, 0], sizes = [1, 256], strides = [1, 1]} : vector<4x256xf32> to vector<1x256xf32>
    %89 = vector.broadcast %87 : vector<3x1xf32> to vector<3x256xf32>
    %90 = vector.broadcast %88 : vector<1x256xf32> to vector<3x256xf32>
    %91 = arith.subf %89, %90 : vector<3x256xf32>
    %92 = arith.mulf %91, %91 : vector<3x256xf32>
    %93 = arith.addf %86, %92 : vector<3x256xf32>
    %94 = vector.extract_strided_slice %78 {offsets = [0, 2], sizes = [3, 1], strides = [1, 1]} : vector<3x4xf32> to vector<3x1xf32>
    %95 = vector.extract_strided_slice %74 {offsets = [2, 0], sizes = [1, 256], strides = [1, 1]} : vector<4x256xf32> to vector<1x256xf32>
    %96 = vector.broadcast %94 : vector<3x1xf32> to vector<3x256xf32>
    %97 = vector.broadcast %95 : vector<1x256xf32> to vector<3x256xf32>
    %98 = arith.subf %96, %97 : vector<3x256xf32>
    %99 = arith.mulf %98, %98 : vector<3x256xf32>
    %100 = arith.addf %93, %99 : vector<3x256xf32>
    %101 = vector.extract_strided_slice %78 {offsets = [0, 3], sizes = [3, 1], strides = [1, 1]} : vector<3x4xf32> to vector<3x1xf32>
    %102 = vector.extract_strided_slice %74 {offsets = [3, 0], sizes = [1, 256], strides = [1, 1]} : vector<4x256xf32> to vector<1x256xf32>
    %103 = vector.broadcast %101 : vector<3x1xf32> to vector<3x256xf32>
    %104 = vector.broadcast %102 : vector<1x256xf32> to vector<3x256xf32>
    %105 = arith.subf %103, %104 : vector<3x256xf32>
    %106 = arith.mulf %105, %105 : vector<3x256xf32>
    %107 = arith.addf %100, %106 : vector<3x256xf32>
    %108 = math.sqrt %107 : vector<3x256xf32>
    %cst_54 = arith.constant 1.000000e-01 : f32
    %109 = vector.broadcast %cst_54 : f32 to vector<3x256xf32>
    %110 = arith.subf %108, %109 : vector<3x256xf32>
    %cst_55 = arith.constant 0.000000e+00 : f32
    %111 = vector.broadcast %cst_55 : f32 to vector<3x256xf32>
    %112 = arith.maximumf %110, %111 : vector<3x256xf32>
    %113 = vector.broadcast %80 : vector<3x1xi32> to vector<3x256xi32>
    %114 = vector.broadcast %76 : vector<1x256xi32> to vector<3x256xi32>
    %115 = arith.cmpi eq, %113, %114 : vector<3x256xi32>
    %c0_56 = arith.constant 0 : index
    %c0_57 = arith.constant 0 : index
    %116 = vector.load %arg19[%c0_56, %c0_57] : memref<3x1xf32, #tpu.memory_space<vmem>>, vector<3x1xf32>
    %cst_58 = arith.constant 0.000000e+00 : f32
    %117 = vector.broadcast %cst_58 : f32 to vector<3x256xf32>
    %118 = arith.select %115, %112, %117 : vector<3x256xi1>, vector<3x256xf32>
    %cst_59 = arith.constant dense<0.000000e+00> : vector<3xf32>
    %119 = vector.multi_reduction <add>, %118, %cst_59 [1] : vector<3x256xf32> to vector<3xf32>
    %120 = vector.shape_cast %119 : vector<3xf32> to vector<3x1xf32>
    %121 = arith.addf %116, %120 : vector<3x1xf32>
    %c0_60 = arith.constant 0 : index
    %c0_61 = arith.constant 0 : index
    %122 = vector.load %arg19[%c0_60, %c0_61] : memref<3x1xf32, #tpu.memory_space<vmem>>, vector<3x1xf32>
    tpu.vector_store %arg19[%c0_60, %c0_61], %121 {strides = array<i32>} : memref<3x1xf32, #tpu.memory_space<vmem>>, vector<3x1xf32>,
    %c0_62 = arith.constant 0 : index
    %c0_63 = arith.constant 0 : index
    %123 = vector.load %arg20[%c0_62, %c0_63] : memref<3x1xf32, #tpu.memory_space<vmem>>, vector<3x1xf32>
    %124 = arith.extui %115 : vector<3x256xi1> to vector<3x256xi32>
    %125 = arith.sitofp %124 : vector<3x256xi32> to vector<3x256xf32>
    %cst_64 = arith.constant dense<0.000000e+00> : vector<3xf32>
    %126 = vector.multi_reduction <add>, %125, %cst_64 [1] : vector<3x256xf32> to vector<3xf32>
    %127 = vector.shape_cast %126 : vector<3xf32> to vector<3x1xf32>
    %128 = arith.addf %123, %127 : vector<3x1xf32>
    %c0_65 = arith.constant 0 : index
    %c0_66 = arith.constant 0 : index
    %129 = vector.load %arg20[%c0_65, %c0_66] : memref<3x1xf32, #tpu.memory_space<vmem>>, vector<3x1xf32>
    tpu.vector_store %arg20[%c0_65, %c0_66], %128 {strides = array<i32>} : memref<3x1xf32, #tpu.memory_space<vmem>>, vector<3x1xf32>,
    %c0_i32_67 = arith.constant 0 : i32
    %130 = arith.cmpi eq, %arg2, %c0_i32_67 : i32
    %131 = arith.extui %130 : i1 to i32
    %c0_i32_68 = arith.constant 0 : i32
    %132 = arith.cmpi ne, %131, %c0_i32_68 : i32
    scf.if %132 {
      %c0_69 = arith.constant 0 : index
      %c0_70 = arith.constant 0 : index
      %133 = vector.load %arg16[%c0_69, %c0_70] : memref<1x1xf32, #tpu.memory_space<vmem>>, vector<1x1xf32>
      %c0_71 = arith.constant 0 : index
      %c0_72 = arith.constant 0 : index
      %c0_73 = arith.constant 0 : index
      %134 = vector.load %arg12[%c0_71, %c0_72, %c0_73] : memref<1x1x1xf32, #tpu.memory_space<vmem>>, vector<1x1x1xf32>
      %135 = vector.shape_cast %134 : vector<1x1x1xf32> to vector<1x1xf32>
      %136 = vector.shape_cast %133 : vector<1x1xf32> to vector<1x1x1xf32>
      tpu.vector_store %arg12[%c0_71, %c0_72, %c0_73], %136 {strides = array<i32>} : memref<1x1x1xf32, #tpu.memory_space<vmem>>, vector<1x1x1xf32>,
      %c0_74 = arith.constant 0 : index
      %c0_75 = arith.constant 0 : index
      %137 = vector.load %arg17[%c0_74, %c0_75] : memref<5x1xf32, #tpu.memory_space<vmem>>, vector<5x1xf32>
      %c0_76 = arith.constant 0 : index
      %c0_77 = arith.constant 0 : index
      %c0_78 = arith.constant 0 : index
      %138 = vector.load %arg13[%c0_76, %c0_77, %c0_78] : memref<1x5x1xf32, #tpu.memory_space<vmem>>, vector<1x5x1xf32>
      %139 = vector.shape_cast %138 : vector<1x5x1xf32> to vector<5x1xf32>
      %140 = vector.shape_cast %137 : vector<5x1xf32> to vector<1x5x1xf32>
      tpu.vector_store %arg13[%c0_76, %c0_77, %c0_78], %140 {strides = array<i32>} : memref<1x5x1xf32, #tpu.memory_space<vmem>>, vector<1x5x1xf32>,
      %c0_79 = arith.constant 0 : index
      %c0_80 = arith.constant 0 : index
      %141 = vector.load %arg18[%c0_79, %c0_80] : memref<1x1xf32, #tpu.memory_space<vmem>>, vector<1x1xf32>
      %c0_81 = arith.constant 0 : index
      %c0_82 = arith.constant 0 : index
      %c0_83 = arith.constant 0 : index
      %142 = vector.load %arg14[%c0_81, %c0_82, %c0_83] : memref<1x1x1xf32, #tpu.memory_space<vmem>>, vector<1x1x1xf32>
      %143 = vector.shape_cast %142 : vector<1x1x1xf32> to vector<1x1xf32>
      %144 = vector.shape_cast %141 : vector<1x1xf32> to vector<1x1x1xf32>
      tpu.vector_store %arg14[%c0_81, %c0_82, %c0_83], %144 {strides = array<i32>} : memref<1x1x1xf32, #tpu.memory_space<vmem>>, vector<1x1x1xf32>,
      %cst_84 = arith.constant 0.000000e+00 : f32
      %145 = vector.broadcast %cst_84 : f32 to vector<3x1xf32>
      %146 = vector.extract_strided_slice %78 {offsets = [0, 0], sizes = [1, 4], strides = [1, 1]} : vector<3x4xf32> to vector<1x4xf32>
      %147 = vector.broadcast %146 : vector<1x4xf32> to vector<3x4xf32>
      %148 = arith.subf %78, %147 : vector<3x4xf32>
      %149 = arith.mulf %148, %148 : vector<3x4xf32>
      %cst_85 = arith.constant dense<0.000000e+00> : vector<3xf32>
      %150 = vector.multi_reduction <add>, %149, %cst_85 [1] : vector<3x4xf32> to vector<3xf32>
      %151 = vector.shape_cast %150 : vector<3xf32> to vector<3x1xf32>
      %152 = math.sqrt %151 : vector<3x1xf32>
      %cst_86 = arith.constant 1.000000e+00 : f32
      %153 = vector.broadcast %cst_86 : f32 to vector<3x1xf32>
      %154 = arith.subf %153, %152 : vector<3x1xf32>
      %cst_87 = arith.constant 0.000000e+00 : f32
      %155 = vector.broadcast %cst_87 : f32 to vector<3x1xf32>
      %156 = arith.maximumf %154, %155 : vector<3x1xf32>
      %157 = arith.addf %145, %156 : vector<3x1xf32>
      %158 = vector.extract_strided_slice %78 {offsets = [1, 0], sizes = [1, 4], strides = [1, 1]} : vector<3x4xf32> to vector<1x4xf32>
      %159 = vector.broadcast %158 : vector<1x4xf32> to vector<3x4xf32>
      %160 = arith.subf %78, %159 : vector<3x4xf32>
      %161 = arith.mulf %160, %160 : vector<3x4xf32>
      %cst_88 = arith.constant dense<0.000000e+00> : vector<3xf32>
      %162 = vector.multi_reduction <add>, %161, %cst_88 [1] : vector<3x4xf32> to vector<3xf32>
      %163 = vector.shape_cast %162 : vector<3xf32> to vector<3x1xf32>
      %164 = math.sqrt %163 : vector<3x1xf32>
      %cst_89 = arith.constant 1.000000e+00 : f32
      %165 = vector.broadcast %cst_89 : f32 to vector<3x1xf32>
      %166 = arith.subf %165, %164 : vector<3x1xf32>
      %cst_90 = arith.constant 0.000000e+00 : f32
      %167 = vector.broadcast %cst_90 : f32 to vector<3x1xf32>
      %168 = arith.maximumf %166, %167 : vector<3x1xf32>
      %169 = arith.addf %157, %168 : vector<3x1xf32>
      %170 = vector.extract_strided_slice %78 {offsets = [2, 0], sizes = [1, 4], strides = [1, 1]} : vector<3x4xf32> to vector<1x4xf32>
      %171 = vector.broadcast %170 : vector<1x4xf32> to vector<3x4xf32>
      %172 = arith.subf %78, %171 : vector<3x4xf32>
      %173 = arith.mulf %172, %172 : vector<3x4xf32>
      %cst_91 = arith.constant dense<0.000000e+00> : vector<3xf32>
      %174 = vector.multi_reduction <add>, %173, %cst_91 [1] : vector<3x4xf32> to vector<3xf32>
      %175 = vector.shape_cast %174 : vector<3xf32> to vector<3x1xf32>
      %176 = math.sqrt %175 : vector<3x1xf32>
      %cst_92 = arith.constant 1.000000e+00 : f32
      %177 = vector.broadcast %cst_92 : f32 to vector<3x1xf32>
      %178 = arith.subf %177, %176 : vector<3x1xf32>
      %cst_93 = arith.constant 0.000000e+00 : f32
      %179 = vector.broadcast %cst_93 : f32 to vector<3x1xf32>
      %180 = arith.maximumf %178, %179 : vector<3x1xf32>
      %181 = arith.addf %169, %180 : vector<3x1xf32>
      %cst_94 = arith.constant 1.000000e+00 : f32
      %182 = vector.broadcast %cst_94 : f32 to vector<3x1xf32>
      %183 = arith.subf %181, %182 : vector<3x1xf32>
      %184 = arith.mulf %78, %78 : vector<3x4xf32>
      %cst_95 = arith.constant dense<0.000000e+00> : vector<3xf32>
      %185 = vector.multi_reduction <add>, %184, %cst_95 [1] : vector<3x4xf32> to vector<3xf32>
      %186 = vector.shape_cast %185 : vector<3xf32> to vector<3x1xf32>
      %187 = math.sqrt %186 : vector<3x1xf32>
      %188 = tpu.iota {dimensions = array<i32: 1>} : vector<3x4xi32>
      %c0_i32_96 = arith.constant 0 : i32
      %189 = vector.broadcast %c0_i32_96 : i32 to vector<3x4xi32>
      %190 = arith.cmpi eq, %188, %189 : vector<3x4xi32>
      %c0_97 = arith.constant 0 : index
      %c0_98 = arith.constant 0 : index
      %191 = vector.load %arg19[%c0_97, %c0_98] : memref<3x1xf32, #tpu.memory_space<vmem>>, vector<3x1xf32>
      %cst_99 = arith.constant 0.000000e+00 : f32
      %192 = vector.shape_cast %191 : vector<3x1xf32> to vector<3x1xf32>
      %193 = vector.broadcast %192 : vector<3x1xf32> to vector<3x4xf32>
      %194 = vector.broadcast %cst_99 : f32 to vector<3x4xf32>
      %195 = arith.select %190, %193, %194 : vector<3x4xi1>, vector<3x4xf32>
      %c1_i32 = arith.constant 1 : i32
      %196 = vector.broadcast %c1_i32 : i32 to vector<3x4xi32>
      %197 = arith.cmpi eq, %188, %196 : vector<3x4xi32>
      %c0_100 = arith.constant 0 : index
      %c0_101 = arith.constant 0 : index
      %198 = vector.load %arg20[%c0_100, %c0_101] : memref<3x1xf32, #tpu.memory_space<vmem>>, vector<3x1xf32>
      %cst_102 = arith.constant 0.000000e+00 : f32
      %199 = vector.shape_cast %198 : vector<3x1xf32> to vector<3x1xf32>
      %200 = vector.broadcast %199 : vector<3x1xf32> to vector<3x4xf32>
      %201 = vector.broadcast %cst_102 : f32 to vector<3x4xf32>
      %202 = arith.select %197, %200, %201 : vector<3x4xi1>, vector<3x4xf32>
      %203 = arith.addf %195, %202 : vector<3x4xf32>
      %c2_i32 = arith.constant 2 : i32
      %204 = vector.broadcast %c2_i32 : i32 to vector<3x4xi32>
      %205 = arith.cmpi eq, %188, %204 : vector<3x4xi32>
      %cst_103 = arith.constant 0.000000e+00 : f32
      %206 = vector.shape_cast %183 : vector<3x1xf32> to vector<3x1xf32>
      %207 = vector.broadcast %206 : vector<3x1xf32> to vector<3x4xf32>
      %208 = vector.broadcast %cst_103 : f32 to vector<3x4xf32>
      %209 = arith.select %205, %207, %208 : vector<3x4xi1>, vector<3x4xf32>
      %210 = arith.addf %203, %209 : vector<3x4xf32>
      %c3_i32 = arith.constant 3 : i32
      %211 = vector.broadcast %c3_i32 : i32 to vector<3x4xi32>
      %212 = arith.cmpi eq, %188, %211 : vector<3x4xi32>
      %cst_104 = arith.constant 0.000000e+00 : f32
      %213 = vector.shape_cast %187 : vector<3x1xf32> to vector<3x1xf32>
      %214 = vector.broadcast %213 : vector<3x1xf32> to vector<3x4xf32>
      %215 = vector.broadcast %cst_104 : f32 to vector<3x4xf32>
      %216 = arith.select %212, %214, %215 : vector<3x4xi1>, vector<3x4xf32>
      %217 = arith.addf %210, %216 : vector<3x4xf32>
      %c0_105 = arith.constant 0 : index
      %c0_106 = arith.constant 0 : index
      %c0_107 = arith.constant 0 : index
      %218 = vector.load %arg15[%c0_105, %c0_106, %c0_107] : memref<1x3x4xf32, #tpu.memory_space<vmem>>, vector<1x3x4xf32>
      %219 = vector.shape_cast %218 : vector<1x3x4xf32> to vector<3x4xf32>
      %220 = vector.shape_cast %217 : vector<3x4xf32> to vector<1x3x4xf32>
      tpu.vector_store %arg15[%c0_105, %c0_106, %c0_107], %220 {strides = array<i32>} : memref<1x3x4xf32, #tpu.memory_space<vmem>>, vector<1x3x4xf32>,
    } else {
    }
    return
  }
  func.func @transform_0(%arg0: i32, %arg1: i32, %arg2: i32) -> (i32, i32, i32) {
    %c1_i32 = arith.constant 1 : i32
    %0 = arith.muli %arg1, %c1_i32 : i32
    %1 = arith.addi %0, %arg2 : i32
    %c0_i32 = arith.constant 0 : i32
    %c0_i32_0 = arith.constant 0 : i32
    return %arg0, %c0_i32, %1 : i32, i32, i32
  }
  func.func @transform_1(%arg0: i32, %arg1: i32, %arg2: i32) -> (i32, i32, i32) {
    %c1_i32 = arith.constant 1 : i32
    %0 = arith.muli %arg1, %c1_i32 : i32
    %1 = arith.addi %0, %arg2 : i32
    %c0_i32 = arith.constant 0 : i32
    %c0_i32_0 = arith.constant 0 : i32
    return %arg0, %c0_i32, %1 : i32, i32, i32
  }
  func.func @transform_2(%arg0: i32, %arg1: i32, %arg2: i32) -> (i32, i32) {
    %c0_i32 = arith.constant 0 : i32
    %c0_i32_0 = arith.constant 0 : i32
    %c0_i32_1 = arith.constant 0 : i32
    return %c0_i32, %c0_i32_0 : i32, i32
  }
  func.func @transform_3(%arg0: i32, %arg1: i32, %arg2: i32) -> (i32, i32, i32) {
    %c1_i32 = arith.constant 1 : i32
    %0 = arith.muli %arg1, %c1_i32 : i32
    %1 = arith.addi %0, %arg2 : i32
    %c0_i32 = arith.constant 0 : i32
    %c0_i32_0 = arith.constant 0 : i32
    return %arg0, %1, %c0_i32 : i32, i32, i32
  }
  func.func @transform_4(%arg0: i32, %arg1: i32, %arg2: i32) -> (i32, i32, i32) {
    %c1_i32 = arith.constant 1 : i32
    %0 = arith.muli %arg1, %c1_i32 : i32
    %1 = arith.addi %0, %arg2 : i32
    %c0_i32 = arith.constant 0 : i32
    %c0_i32_0 = arith.constant 0 : i32
    return %arg0, %1, %c0_i32 : i32, i32, i32
  }
  func.func @transform_5(%arg0: i32, %arg1: i32, %arg2: i32) -> (i32, i32, i32) {
    %c1_i32 = arith.constant 1 : i32
    %0 = arith.muli %arg1, %c1_i32 : i32
    %1 = arith.addi %0, %arg2 : i32
    %c0_i32 = arith.constant 0 : i32
    %c0_i32_0 = arith.constant 0 : i32
    return %arg0, %c0_i32, %1 : i32, i32, i32
  }
  func.func @transform_6(%arg0: i32, %arg1: i32, %arg2: i32) -> (i32, i32, i32) {
    %c1_i32 = arith.constant 1 : i32
    %0 = arith.muli %arg1, %c1_i32 : i32
    %1 = arith.addi %0, %arg2 : i32
    %c0_i32 = arith.constant 0 : i32
    %c0_i32_0 = arith.constant 0 : i32
    return %arg0, %c0_i32, %1 : i32, i32, i32
  }
  func.func @transform_7(%arg0: i32, %arg1: i32, %arg2: i32) -> (i32, i32, i32) {
    %c0_i32 = arith.constant 0 : i32
    %c0_i32_0 = arith.constant 0 : i32
    %c0_i32_1 = arith.constant 0 : i32
    return %arg0, %c0_i32, %c0_i32_0 : i32, i32, i32
  }
  func.func @transform_8(%arg0: i32, %arg1: i32, %arg2: i32) -> (i32, i32, i32) {
    %c0_i32 = arith.constant 0 : i32
    %c0_i32_0 = arith.constant 0 : i32
    %c0_i32_1 = arith.constant 0 : i32
    return %arg0, %c0_i32, %c0_i32_0 : i32, i32, i32
  }
  func.func @transform_9(%arg0: i32, %arg1: i32, %arg2: i32) -> (i32, i32, i32) {
    %c1_i32 = arith.constant 1 : i32
    %0 = arith.muli %arg0, %c1_i32 : i32
    %1 = arith.addi %0, %arg1 : i32
    %c0_i32 = arith.constant 0 : i32
    %c0_i32_0 = arith.constant 0 : i32
    %c0_i32_1 = arith.constant 0 : i32
    return %1, %c0_i32, %c0_i32_0 : i32, i32, i32
  }
  func.func @transform_10(%arg0: i32, %arg1: i32, %arg2: i32) -> (i32, i32, i32) {
    %c1_i32 = arith.constant 1 : i32
    %0 = arith.muli %arg0, %c1_i32 : i32
    %1 = arith.addi %0, %arg1 : i32
    %c0_i32 = arith.constant 0 : i32
    %c0_i32_0 = arith.constant 0 : i32
    %c0_i32_1 = arith.constant 0 : i32
    return %1, %c0_i32, %c0_i32_0 : i32, i32, i32
  }
  func.func @transform_11(%arg0: i32, %arg1: i32, %arg2: i32) -> (i32, i32, i32) {
    %c1_i32 = arith.constant 1 : i32
    %0 = arith.muli %arg0, %c1_i32 : i32
    %1 = arith.addi %0, %arg1 : i32
    %c0_i32 = arith.constant 0 : i32
    %c0_i32_0 = arith.constant 0 : i32
    %c0_i32_1 = arith.constant 0 : i32
    return %1, %c0_i32, %c0_i32_0 : i32, i32, i32
  }
  func.func @transform_12(%arg0: i32, %arg1: i32, %arg2: i32) -> (i32, i32, i32) {
    %c1_i32 = arith.constant 1 : i32
    %0 = arith.muli %arg0, %c1_i32 : i32
    %1 = arith.addi %0, %arg1 : i32
    %c0_i32 = arith.constant 0 : i32
    %c0_i32_0 = arith.constant 0 : i32
    %c0_i32_1 = arith.constant 0 : i32
    return %1, %c0_i32, %c0_i32_0 : i32, i32, i32
  }
}

</mosaic_0001>

<bundles_post_ra>
// kernel: tpu_custom_call.1
= control target key start
LH: loop header
LB: loop body
LE: loop exit
PB: predicated region body
PF: predicated region fallthrough
CT: control target
= control target key end

     0   :  { %s1571_s21 = smov 0   ;;  %s1573_s22 = smov 0   ;;  %s1809_s0 = inlined_call_operand.vmem [shape: f32[2,5,256], index: 0, kind: input, shape index: {}]   ;;  %s1810_s1 = inlined_call_operand.vmem [shape: s32[2,1,256], index: 1, kind: input, shape index: {}]   ;;  %s1811_s2 = inlined_call_operand.vmem [shape: f32[5,1], index: 2, kind: input, shape index: {}]   ;;  %s1812_s3 = inlined_call_operand.vmem [shape: f32[2,2,128], index: 3, kind: input, shape index: {}]   ;;  %s1813_s4 = inlined_call_operand.vmem [shape: f32[2,2,128], index: 4, kind: input, shape index: {}]   ;;  %s1814_s5 = inlined_call_operand.vmem [shape: f32[2,4,256], index: 5, kind: input, shape index: {}]   ;;  %s1815_s6 = inlined_call_operand.vmem [shape: s32[2,1,256], index: 6, kind: input, shape index: {}]   ;;  %s1816_s7 = inlined_call_operand.vmem [shape: f32[2,3,4], index: 7, kind: input, shape index: {}]   ;;  %s1817_s8 = inlined_call_operand.vmem [shape: s32[2,3,1], index: 8, kind: input, shape index: {}]   ;;  %s1818_s9 = inlined_call_operand.vmem [shape: f32[2,1,1], index: 9, kind: output, shape index: {0}]   ;;  %s1819_s10 = inlined_call_operand.vmem [shape: f32[2,5,1], index: 10, kind: output, shape index: {1}]   ;;  %s1820_s11 = inlined_call_operand.vmem [shape: f32[2,1,1], index: 11, kind: output, shape index: {2}]   ;;  %s1821_s12 = inlined_call_operand.vmem [shape: f32[2,3,4], index: 12, kind: output, shape index: {3}]  }
   0x1   :  { %s1575_s23 = smov 0  }
   0x2 LB: > { %s42_s24 = sadd.s32 1, %s1494_s22  ;;  %p1393_p0 = scmp.ge.s32.totalorder %s1498_s23, 1  ;;  %s1498_s23 = sphi %s1575_s23, %s23_s23   ;;  %s1494_s22 = sphi %s1573_s22, %s1831_s22   ;;  %s1490_s21 = sphi %s1571_s21, %s1830_s21  }
   0x3   : > { %p44_p1 = scmp.ge.s32.totalorder %s42_s24, 2  ;;  %p522_p2 = scmp.lt.s32.totalorder %s1498_s23, 3 }
   0x5   : > { %s1833_s24 = smov (%p44_p1, %s42_s24), 0  ;;  %p523_p3 = pnand %p1393_p0, %p522_p2 }
   0x6   : > { %p636_p4 = scmp.lt.s32.totalorder (!%p523_p3), %s1490_s21, 1 }
   0x7   : > { %526 = sbr.rel (%p523_p3) target bundleno = 429 (0x1ad), region = 56 }
   0xc   : > { %v1500_v0 = vmov 0   ;;  %v1501_v1 = vmov 2   ;;  %s1835_s21 = smov (!%p636_p4, %s1490_s21), 1  ;;  %v743_v4 = vld [vmem:[%s1811_s2] sm:$0x1f]  ;;  %v1502_v5 = vmov 1   ;;  %v744_v61 = vlaneseq }
   0xd   : > { %1447 = vset.pattern.permute.xlu0 %v1500_v0  ;;  %1449 = vset.pattern.permute.xlu1 %v1501_v1  ;;  %s1592_s25 = sshll.u32 %s1835_s21, 2  ;;  %v1503_v6 = vmov 3   ;;  %s1415_s16 = sshll.u32 %s1835_s21, 4  ;;  %vm750_vm0 = vcmask 1044480   ;;  %vm986_vm1 = vcmask 1042432   ;;  %v1504_v23 = vmov 0.0  }
   0xe   : > { %1451 = vset.pattern.permute.xlu2 %v1500_v0  ;;  %s701_s28 = scalar_lea.vmem %s1816_s7, %s1592_s25  ;;  %s705_s13 = scalar_lea.vmem %s1817_s8, %s1592_s25  ;;  %vm1019_vm4 = vcmask 26624   ;;  %vm737_vm7 = vcmask 2048   ;;  %vm867_vm13 = vcmask 1041408   ;;  %vm732_vm14 = vcmask 0  }
   0xf   : > { %v1602_v2 = vld [vmem:[%s701_s28] sm:$0x7]  ;;  %s1613_s17 = sshll.u32 %s1835_s21, 1  ;;  %s643_s20 = scalar_lea.vmem %s1809_s0, %s1415_s16  ;;  %739 = vst.msk [vmem:[#allocation6] sm:$0x7] %vm737_vm7, %v1504_v23  ;;  %vm734_vm15 = vcmask 4096  }
  0x10   : > { %v883_v3 = vld [vmem:[%s705_s13] sm:$0x7]  ;;  %886 = vperm.xlu0 %1447, %v1602_v2   ;;  %917 = vperm.xlu1 %1449, %v1602_v2   ;;  %s695_s28 = scalar_lea.vmem %s1815_s6, %s1613_s17  ;;  %v1624_v8 = vld [vmem:[%s643_s20 + $0x8] sm:$0x1f]  ;;  %v1016_v33 = vperm.slane %v1602_v2, 0  ;;  %v1038_v34 = vperm.slane %v1602_v2, 1  ;;  %s654_s18 = scalar_lea.vmem %s1810_s1, %s1613_s17  ;;  %v1081_v21 = vmul.f32 %v1602_v2, %v1602_v2 }
  0x11   : > { %977 = vperm.xlu2 %1451, %v883_v3   ;;  %v1622_v7 = vld [vmem:[%s643_s20] sm:$0x1f]  ;;  %v758_v12 = vsel %vm750_vm0, %v1624_v8, -inf  ;;  %v1059_v39 = vperm.slane %v1602_v2, 2  ;;  %s1416_s29 = sshll.u32 %s1835_s21, 3  ;;  %s664_s26 = scalar_lea.vmem %s1812_s3, %s1613_s17 }
  0x12   : > { %v881_v9 = vld [vmem:[%s695_s28] sm:$0x3]  ;;  %v751_v10 = vsel %vm750_vm0, %v1622_v7, -inf  ;;  %v759_v13 = vrot.slane %v758_v12, 4  ;;  %v1017_v37 = vsub.f32 %v1602_v2, %v1016_v33  ;;  %v1039_v38 = vsub.f32 %v1602_v2, %v1038_v34  ;;  %s684_s14 = scalar_lea.vmem %s1814_s5, %s1416_s29  ;;  %738 = vst.msk [vmem:[#allocation5] sm:$0x7] %vm737_vm7, %v1504_v23  ;;  %s673_s30 = scalar_lea.vmem %s1813_s4, %s1613_s17 }
  0x13   : > { %v752_v11 = vrot.slane %v751_v10, 4  ;;  %v979_v14 = vperm.slane %v881_v9, 0  ;;  %v980_v15 = vperm.slane %v881_v9, 1  ;;  %v1060_v44 = vsub.f32 %v1602_v2, %v1059_v39  ;;  %v880_v51 = vld [vmem:[%s684_s14] sm:$0xff]  ;;  %733 = vst.msk [vmem:[#allocation2] sm:$0x1] %vm732_vm14, %v1504_v23  ;;  %s709_s14 = scalar_lea.vmem %s1818_s9, %s1835_s21  ;;  %s726_s27 = scalar_lea.vmem %s1821_s12, %s1592_s25 }
  0x14   : > { %v760_v17 = vmax.f32 %v758_v12, %v759_v13  ;;  %v1018_v42 = vmul.f32 %v1017_v37, %v1017_v37  ;;  %v1040_v43 = vmul.f32 %v1039_v38, %v1039_v38  ;;  %v890_v54 = vperm.slane %v880_v51, 0  ;;  %v742_v3 = vld [vmem:[%s654_s18] sm:$0x3]  ;;  %736 = vst.msk [vmem:[#allocation4] sm:$0x1] %vm732_vm14, %v1504_v23  ;;  %s720_s18 = scalar_lea.vmem %s1820_s11, %s1835_s21 }
  0x15   : > { %v753_v16 = vmax.f32 %v751_v10, %v752_v11  ;;  %v1061_v47 = vmul.f32 %v1060_v44, %v1060_v44  ;;  %v891_v56 = vperm.slane %v880_v51, 4  ;;  %v920_v58 = vperm.slane %v880_v51, 2  ;;  %v852_v22 = vld [vmem:[%s664_s26] sm:$0x3]  ;;  %735 = vst.msk [vmem:[#allocation3] sm:$0x1f] %vm734_vm15, %v1504_v23  ;;  %s715_s26 = scalar_lea.vmem %s1819_s10, %s1416_s29 }
  0x16   : > { %v761_v20 = vrot.slane %v760_v17, 2  ;;  %v1020_v45 = vsel %vm1019_vm4, %v1018_v42, 0.0  ;;  %v1041_v46 = vsel %vm1019_vm4, %v1040_v43, 0.0  ;;  %v921_v59 = vperm.slane %v880_v51, 6 }
  0x17   : > { %v754_v18 = vrot.slane %v753_v16, 2  ;;  %v1062_v50 = vsel %vm1019_vm4, %v1061_v47, 0.0  ;;  %v904_v60 = vperm.slane %v880_v51, 1  ;;  %v905_v63 = vperm.slane %v880_v51, 5 }
  0x18   : > { %1448 = vset.pattern.permute.xlu0 %v1502_v5  ;;  %1450 = vset.pattern.permute.xlu1 %v1503_v6  ;;  %v762_v27 = vmax.f32 %v760_v17, %v761_v20  ;;  %v937_v1 = vperm.slane %v880_v51, 7  ;;  %v894_v5 = vperm.slane %v890_v54, 0  ;;  %v895_v6 = vperm.slane %v891_v56, 0 }
  0x19   : > { %901 = vperm.xlu0 %1448, %v1602_v2   ;;  %933 = vperm.xlu1 %1450, %v1602_v2   ;;  %v755_v26 = vmax.f32 %v753_v16, %v754_v18  ;;  %v924_v9 = vperm.slane %v920_v58, 2  ;;  %v925_v11 = vperm.slane %v921_v59, 2  ;;  %v745_v12 = vshrl.u32 %v744_v61, 7 }
  0x1a   : > { %809 = vperm.xlu2 %1451, %v743_v4   ;;  %v763_v32 = vrot.slane %v762_v27, 1  ;;  %v746_v13 = vperm.slane %v742_v3, 0  ;;  %v909_v16 = vperm.slane %v905_v63, 1  ;;  %v941_v18 = vperm.slane %v937_v1, 3 }
  0x1b   : > { %v756_v31 = vrot.slane %v755_v26, 1  ;;  %v747_v20 = vperm.slane %v742_v3, 1 }
  0x1c   : > { %v1650_v36 = vmax.f32 %v762_v27, %v763_v32  ;;  %vm1676_vm5 = vcmp.eq.s32.totalorder %v745_v12, %v746_v13 }
  0x1d   : > { %v1648_v35 = vmax.f32 %v755_v26, %v756_v31  ;;  %vm1680_vm6 = vcmp.eq.s32.totalorder %v745_v12, %v747_v20 }
  0x1e   : > { %v766_v41 = vsub.f32 %v1624_v8, %v1650_v36 }
  0x1f   : > { %v765_v40 = vsub.f32 %v1622_v7, %v1648_v35 }
  0x20   : > { %v769_v49 = vmul.f32 1.442695, %v766_v41 }
  0x21   : > { %1453 = vset.pattern.permute.xlu1 %v1500_v0  ;;  %1452 = vset.pattern.permute.xlu0 %v1500_v0  ;;  %v767_v48 = vmul.f32 1.442695, %v765_v40  ;;  %v936_v0 = vperm.slane %v880_v51, 3 }
  0x23   : > { %1454 = vpow2.f32 %v767_v48  ;;  %v940_v17 = vperm.slane %v936_v0, 3 }
  0x24   : > { %1456 = vpow2.f32 %v769_v49 }
  0x29   : > { %v1455_v52 = vpop.eup %1454 }
  0x2a   : > { %v1457_v53 = vpop.eup %1456  ;;  %v771_v62 = vsel %vm750_vm0, %v1455_v52, 0.0 }
  0x2b   : > { %v778_v4 = vsel %vm750_vm0, %v1457_v53, 0.0  ;;  %v772_v10 = vrot.slane %v771_v62, 4  ;;  %v792_v53 = vsel %vm1680_vm6, %v1624_v8, 0.0 }
  0x43   : > { %1021 = vadd.xlane.f32.xlu0 %v1020_v45  ;;  %1063 = vadd.xlane.f32.xlu1 %v1062_v50 }
  0x6b   : > { %v978_v19 = vpop.permute.xlu2 %977 }
  0x6c   : > { %vm1630_vm2 = vcmp.eq.s32.totalorder %v978_v19, %v979_v14  ;;  %vm1634_vm3 = vcmp.eq.s32.totalorder %v978_v19, %v980_v15  ;;  %v779_v14 = vrot.slane %v778_v4, 4  ;;  %v908_v15 = vperm.slane %v904_v60, 1 }
  0x6d   : > { %v1410_v24 = vsel %vm1630_vm2, 1.0, %v1504_v23  ;;  %v1411_v25 = vsel %vm1634_vm3, 1.0, %v1504_v23 }
  0x6e   : > { %v1000_v28 = vsel %vm986_vm1, %v1410_v24, 0.0  ;;  %v1001_v29 = vsel %vm986_vm1, %v1411_v25, 0.0  ;;  %v773_v25 = vadd.f32 %v772_v10, %v771_v62  ;;  %v780_v31 = vadd.f32 %v779_v14, %v778_v4 }
  0x6f   : > { %v1002_v30 = vadd.f32 %v1001_v29, %v1000_v28 }
  0x70   : > { %v774_v43 = vrot.slane %v773_v25, 2  ;;  %v781_v47 = vrot.slane %v780_v31, 2 }
  0x71   : > { %1003 = vadd.xlane.f32.xlu2 %v1002_v30  ;;  %v828_v30 = vld [vmem:[#allocation2] sm:$0x1] }
  0x72   : > { %v775_v56 = vadd.f32 %v774_v43, %v773_v25  ;;  %v782_v58 = vadd.f32 %v781_v47, %v780_v31 }
  0x74   : > { %v810_v52 = vpop.permute.xlu2 %809  ;;  %v776_v8 = vrot.slane %v775_v56, 1  ;;  %v783_v4 = vrot.slane %v782_v58, 1 }
  0x75   : > { %v812_v62 = vsel %vm1676_vm5, %v810_v52, 0.0  ;;  %v813_v63 = vsel %vm1680_vm6, %v810_v52, 0.0 }
  0x76   : > { %v814_v3 = vsel %vm750_vm0, %v812_v62, 0.0  ;;  %v777_v10 = vadd.f32 %v776_v8, %v775_v56  ;;  %v784_v13 = vadd.f32 %v783_v4, %v782_v58 }
  0x79   : > { %1042 = vadd.xlane.f32.xlu2 %v1041_v46  ;;  %v791_v46 = vsel %vm1676_vm5, %v1622_v7, 0.0  ;;  %v800_v7 = vsel %vm750_vm0, %v792_v53, 0.0 }
  0x7a   : > { %v801_v1 = vrot.slane %v800_v7, 4 }
  0x82   : > { %v887_v55 = vpop.permute.xlu0 %886  ;;  %v918_v57 = vpop.permute.xlu1 %917 }
  0x83   : > { %v896_v19 = vsub.f32 %v887_v55, %v894_v5  ;;  %v897_v24 = vsub.f32 %v887_v55, %v895_v6  ;;  %v926_v26 = vsub.f32 %v918_v57, %v924_v9  ;;  %v927_v27 = vsub.f32 %v918_v57, %v925_v11 }
  0x84   : > { %v793_v57 = vsel %vm750_vm0, %v791_v46, 0.0  ;;  %v821_v5 = vsel %vm750_vm0, %v813_v63, 0.0  ;;  %v815_v9 = vrot.slane %v814_v3, 4  ;;  %v802_v11 = vadd.f32 %v801_v1, %v800_v7 }
  0x85   : > { %v898_v38 = vmul.f32 %v896_v19, %v896_v19  ;;  %v899_v40 = vmul.f32 %v897_v24, %v897_v24  ;;  %v928_v44 = vmul.f32 %v926_v26, %v926_v26  ;;  %v929_v45 = vmul.f32 %v927_v27, %v927_v27 }
  0x86   : > { %v794_v0 = vrot.slane %v793_v57, 4  ;;  %v822_v12 = vrot.slane %v821_v5, 4  ;;  %v803_v20 = vrot.slane %v802_v11, 2 }
  0x88   : > { %v795_v6 = vadd.f32 %v794_v0, %v793_v57  ;;  %v823_v24 = vadd.f32 %v822_v12, %v821_v5 }
  0x8b   : > { %v902_v28 = vpop.permute.xlu0 %901  ;;  %v934_v29 = vpop.permute.xlu1 %933 }
  0x8c   : > { %v910_v32 = vsub.f32 %v902_v28, %v908_v15  ;;  %v911_v33 = vsub.f32 %v902_v28, %v909_v16  ;;  %v942_v34 = vsub.f32 %v934_v29, %v940_v17  ;;  %v943_v37 = vsub.f32 %v934_v29, %v941_v18 }
  0x8d   : > { %v796_v17 = vrot.slane %v795_v6, 2  ;;  %v816_v18 = vadd.f32 %v815_v9, %v814_v3 }
  0x8e   : > { %v912_v41 = vmul.f32 %v910_v32, %v910_v32  ;;  %v913_v42 = vmul.f32 %v911_v33, %v911_v33  ;;  %v944_v50 = vmul.f32 %v942_v34, %v942_v34  ;;  %v945_v51 = vmul.f32 %v943_v37, %v943_v37 }
  0x8f   : > { %v817_v28 = vrot.slane %v816_v18, 2  ;;  %v797_v31 = vadd.f32 %v796_v17, %v795_v6  ;;  %v824_v32 = vrot.slane %v823_v24, 2  ;;  %v804_v34 = vadd.f32 %v803_v20, %v802_v11 }
  0x90   : > { %v914_v48 = vadd.f32 %v912_v41, %v898_v38  ;;  %v915_v49 = vadd.f32 %v913_v42, %v899_v40  ;;  %v1082_v17 = vsel %vm1019_vm4, %v1081_v21, 0.0  ;;  %v1505_v20 = vmov 0.99  }
  0x91   : > { %v818_v42 = vadd.f32 %v817_v28, %v816_v18  ;;  %v805_v47 = vrot.slane %v804_v34, 1  ;;  %v995_v18 = vld [vmem:[#allocation6] sm:$0x7]  ;;  %1083 = vadd.xlane.f32.xlu2 %v1082_v17 }
  0x92   : > { %v930_v54 = vadd.f32 %v928_v44, %v914_v48  ;;  %v931_v55 = vadd.f32 %v929_v45, %v915_v49  ;;  %v798_v44 = vrot.slane %v797_v31, 1  ;;  %v825_v45 = vadd.f32 %v824_v32, %v823_v24 }
  0x93   : > { %v819_v7 = vrot.slane %v818_v42, 1 }
  0x94   : > { %v946_v59 = vadd.f32 %v944_v50, %v930_v54  ;;  %v1691_v60 = vadd.f32 %v945_v51, %v931_v55  ;;  %v799_v56 = vadd.f32 %v798_v44, %v797_v31  ;;  %v826_v62 = vrot.slane %v825_v45, 1 }
  0x95   : > { %v820_v5 = vadd.f32 %v819_v7, %v818_v42 }
  0x96   : > { %1458 = vrsqrt.f32 %v946_v59  ;;  %vm955_vm8 = vcmp.eq.f32.partialorder %v946_v59, inf  ;;  %v958_v48 = vand.u32 2147483648, %v946_v59  ;;  %vm957_vm9 = vcmp.eq.f32.partialorder %v946_v59, 0.0 }
  0x97   : > { %1460 = vrsqrt.f32 %v1691_v60  ;;  %vm967_vm10 = vcmp.eq.f32.partialorder %v1691_v60, inf  ;;  %v970_v53 = vand.u32 2147483648, %v1691_v60  ;;  %vm969_vm11 = vcmp.eq.f32.partialorder %v1691_v60, 0.0 }
  0x98   : > { %1462 = vlog2.f32 %v777_v10 }
  0x99   : > { %1464 = vlog2.f32 %v784_v13 }
  0x9c   : > { %v1459_v14 = vpop.eup %1458 }
  0x9d   : > { %v1461_v15 = vpop.eup %1460  ;;  %v949_v16 = vmul.f32 %v1459_v14, %v946_v59 }
  0x9e   : > { %v961_v19 = vmul.f32 %v1461_v15, %v1691_v60  ;;  %v1463_v37 = vpop.eup %1462 }
  0x9f   : > { %v950_v25 = vmul.f32 %v1459_v14, %v949_v16  ;;  %v1465_v40 = vpop.eup %1464  ;;  %v786_v50 = vmul.f32 0.6931472, %v1463_v37  ;;  %v855_v16 = vsub.f32 1.0, %v852_v22 }
  0xa0   : > { %v962_v26 = vmul.f32 %v1461_v15, %v961_v19  ;;  %v788_v51 = vmul.f32 0.6931472, %v1465_v40  ;;  %v1407_v40 = vsel %vm1680_vm6, 1.0, %v1504_v23 }
  0xa1   : > { %v951_v27 = vmul.f32 0.5, %v950_v25  ;;  %v789_v0 = vadd.f32 %v786_v50, %v1648_v35  ;;  %v845_v42 = vsel %vm750_vm0, %v1407_v40, 0.0 }
  0xa2   : > { %v963_v29 = vmul.f32 0.5, %v962_v26  ;;  %v790_v8 = vadd.f32 %v788_v51, %v1650_v36 }
  0xa3   : > { %v952_v33 = vsub.f32 1.5, %v951_v27  ;;  %v829_v10 = vsub.f32 %v789_v0, %v799_v56 }
  0xa4   : > { %v964_v38 = vsub.f32 1.5, %v963_v29 }
  0xa5   : > { %v953_v41 = vmul.f32 %v1459_v14, %v952_v33  ;;  %v831_v12 = vmul.f32 %v829_v10, %v820_v5 }
  0xa6   : > { %v965_v43 = vmul.f32 %v1461_v15, %v964_v38  ;;  %v853_v15 = vld [vmem:[%s673_s30] sm:$0x3]  ;;  %v1406_v38 = vsel %vm1676_vm5, 1.0, %v1504_v23 }
  0xa7   : > { %v954_v46 = vmul.f32 %v953_v41, %v946_v59  ;;  %vm854_vm12 = vcmp.ne.f32.partialorder %v853_v15, 0.0  ;;  %v844_v41 = vsel %vm750_vm0, %v1406_v38, 0.0 }
  0xa8   : > { %v966_v49 = vmul.f32 %v965_v43, %v1691_v60  ;;  %v856_v19 = vsel %vm854_vm12, %v852_v22, %v855_v16  ;;  %v857_v24 = vsel %vm854_vm12, 0.01, %v1505_v20  ;;  %v846_v43 = vadd.f32 %v845_v42, %v844_v41 }
  0xa9   : > { %v956_v52 = vsel %vm955_vm8, %v946_v59, %v954_v46  ;;  %v806_v59 = vadd.f32 %v805_v47, %v804_v34  ;;  %v859_v25 = vsub.f32 1.0, %v856_v19  ;;  %v862_v26 = vmax.f32 %v856_v19, 0.0001  ;;  %v983_v46 = vld [vmem:[#allocation5] sm:$0x7] }
  0xaa   : > { %v959_v54 = vsel %vm957_vm9, %v958_v48, %v956_v52  ;;  %v968_v55 = vsel %vm967_vm10, %v1691_v60, %v966_v49  ;;  %v827_v60 = vadd.f32 %v826_v62, %v825_v45  ;;  %v858_v29 = vsub.f32 0.0, %v857_v24  ;;  %847 = vadd.xlane.f32.xlu2 %v846_v43 }
  0xab   : > { %v971_v57 = vsel %vm969_vm11, %v970_v53, %v968_v55  ;;  %v1408_v58 = vadd.f32 -0.1, %v959_v54  ;;  %v830_v11 = vsub.f32 %v790_v8, %v806_v59  ;;  %1466 = vlog2.f32 %v862_v26 }
  0xac   : > { %v1409_v63 = vadd.f32 -0.1, %v971_v57  ;;  %v860_v31 = vmul.f32 %v859_v25, %v859_v25 }
  0xad   : > { %v974_v1 = vmax.f32 %v1408_v58, 0.0  ;;  %v832_v13 = vmul.f32 %v830_v11, %v827_v60 }
  0xae   : > { %v975_v3 = vmax.f32 %v1409_v63, 0.0  ;;  %v861_v2 = vmul.f32 %v860_v31, %v858_v29  ;;  %v866_v63 = vld [vmem:[#allocation4] sm:$0x1] }
  0xaf   : > { %v984_v4 = vsel %vm1630_vm2, %v974_v1, 0.0  ;;  %v833_v14 = vadd.f32 %v832_v13, %v831_v12  ;;  %v839_v12 = vld [vmem:[#allocation3] sm:$0x1f] }
  0xb0   : > { %v985_v6 = vsel %vm1634_vm3, %v975_v3, 0.0  ;;  %v987_v9 = vsel %vm986_vm1, %v984_v4, 0.0 }
  0xb1   : > { %v988_v35 = vsel %vm986_vm1, %v985_v6, 0.0  ;;  %v1467_v32 = vpop.eup %1466 }
  0xb2   : > { %v989_v36 = vadd.f32 %v988_v35, %v987_v9  ;;  %v864_v33 = vmul.f32 0.6931472, %v1467_v32 }
  0xb4   : > { %990 = vadd.xlane.f32.xlu1 %v989_v36  ;;  %v865_v34 = vmul.f32 %v864_v33, %v861_v2 }
  0xb6   : > { %v868_v37 = vsel %vm867_vm13, %v865_v34, 0.0  ;;  %v1744_v45 = vpop.xlane.xlu1 %1063  ;;  %v1753_v52 = vpop.xlane.xlu0 %1021 }
  0xb7   : > { %869 = vadd.xlane.f32.xlu0 %v868_v37  ;;  %1468 = vrsqrt.f32 %v1753_v52  ;;  %vm1030_vm0 = vcmp.eq.f32.partialorder %v1753_v52, inf  ;;  %vm1032_vm2 = vcmp.eq.f32.partialorder %v1753_v52, 0.0  ;;  %vm1072_vm5 = vcmp.eq.f32.partialorder %v1744_v45, inf }
  0xb8   : > { %v1075_v38 = vand.u32 2147483648, %v1744_v45  ;;  %vm1074_vm6 = vcmp.eq.f32.partialorder %v1744_v45, 0.0 }
  0xbc   : > { %834 = vadd.xlane.f32.xlu1 %v833_v14 }
  0xbd   : > { %v1469_v8 = vpop.eup %1468 }
  0xbe   : > { %v1024_v1 = vmul.f32 %v1469_v8, %v1753_v52 }
  0xc0   : > { %v1025_v5 = vmul.f32 %v1469_v8, %v1024_v1 }
  0xc2   : > { %v1026_v11 = vmul.f32 0.5, %v1025_v5 }
  0xc4   : > { %v1027_v13 = vsub.f32 1.5, %v1026_v11 }
  0xc6   : > { %v1028_v16 = vmul.f32 %v1469_v8, %v1027_v13 }
  0xc8   : > { %v1029_v20 = vmul.f32 %v1028_v16, %v1753_v52 }
  0xca   : > { %v1031_v31 = vsel %vm1030_vm0, %v1753_v52, %v1029_v20 }
  0xe4   : > { %v1004_v27 = vpop.xlane.xlu2 %1003 }
  0xe5   : > { %v1005_v28 = vadd.f32 %v1004_v27, %v995_v18 }
  0xe7   : > { %1006 = vst.msk [vmem:[#allocation6] sm:$0x7] %vm737_vm7, %v1005_v28  ;;  %v1033_v28 = vand.u32 2147483648, %v1753_v52 }
  0xe9   : > { %v1034_v34 = vsel %vm1032_vm2, %v1033_v28, %v1031_v31 }
  0xea   : > { %v1035_v42 = vsub.f32 1.0, %v1034_v34 }
  0xec   : > { %v1043_v57 = vpop.xlane.xlu2 %1042 }
  0xed   : > { %1470 = vrsqrt.f32 %v1043_v57  ;;  %vm1051_vm1 = vcmp.eq.f32.partialorder %v1043_v57, inf  ;;  %v1054_v29 = vand.u32 2147483648, %v1043_v57  ;;  %vm1053_vm3 = vcmp.eq.f32.partialorder %v1043_v57, 0.0 }
  0xee   : > { %v1108_v44 = vld [vmem:[#allocation6] sm:$0x7]  ;;  %1472 = vrsqrt.f32 %v1744_v45 }
  0xef   : > { %1111 = vperm.xlu1 %1453, %v1108_v44  }
  0xf3   : > { %v1471_v59 = vpop.eup %1470 }
  0xf4   : > { %v1045_v3 = vmul.f32 %v1471_v59, %v1043_v57  ;;  %v1473_v4 = vpop.eup %1472 }
  0xf5   : > { %v1066_v6 = vmul.f32 %v1473_v4, %v1744_v45 }
  0xf6   : > { %v1046_v60 = vmul.f32 %v1471_v59, %v1045_v3 }
  0xf7   : > { %v1067_v36 = vmul.f32 %v1473_v4, %v1066_v6 }
  0xf8   : > { %v1047_v35 = vmul.f32 0.5, %v1046_v60 }
  0xf9   : > { %v1068_v21 = vmul.f32 0.5, %v1067_v36 }
  0xfa   : > { %v1048_v14 = vsub.f32 1.5, %v1047_v35 }
  0xfb   : > { %v1069_v18 = vsub.f32 1.5, %v1068_v21 }
  0xfc   : > { %v1049_v17 = vmul.f32 %v1471_v59, %v1048_v14 }
  0xfd   : > { %v1070_v25 = vmul.f32 %v1473_v4, %v1069_v18 }
  0xfe   : > { %v1050_v24 = vmul.f32 %v1049_v17, %v1043_v57 }
  0xff   : > { %v1071_v2 = vmul.f32 %v1070_v25, %v1744_v45 }
 0x100   : > { %v1052_v32 = vsel %vm1051_vm1, %v1043_v57, %v1050_v24 }
 0x101   : > { %v1055_v37 = vsel %vm1053_vm3, %v1054_v29, %v1052_v32  ;;  %v1073_v40 = vsel %vm1072_vm5, %v1744_v45, %v1071_v2 }
 0x102   : > { %v1056_v43 = vsub.f32 1.0, %v1055_v37  ;;  %v1076_v44 = vsel %vm1074_vm6, %v1075_v38, %v1073_v40 }
 0x104   : > { %v1763_v9 = vpop.xlane.xlu2 %1083 }
 0x105   : > { %1474 = vrsqrt.f32 %v1763_v9  ;;  %vm1094_vm10 = vcmp.eq.f32.partialorder %v1763_v9, 0.0 }
 0x10b   : > { %v1475_v19 = vpop.eup %1474 }
 0x10c   : > { %v1086_v26 = vmul.f32 %v1475_v19, %v1763_v9 }
 0x10e   : > { %v1087_v33 = vmul.f32 %v1475_v19, %v1086_v26 }
 0x110   : > { %v1088_v41 = vmul.f32 0.5, %v1087_v33 }
 0x11d   : > { %v848_v22 = vpop.xlane.xlu2 %847 }
 0x11e   : > { %v849_v15 = vadd.f32 %v848_v22, %v839_v12 }
 0x120   : > { %851 = vst.msk [vmem:[#allocation3] sm:$0x1f] %vm734_vm15, %v849_v15 }
 0x127   : > { %v991_v47 = vpop.xlane.xlu1 %990  ;;  %v1012_v27 = vld [vmem:[#allocation3] sm:$0x1f] }
 0x128   : > { %v992_v48 = vadd.f32 %v991_v47, %v983_v46  ;;  %1013 = vst.msk [vmem:[%s715_s26] sm:$0x1f] %vm734_vm15, %v1012_v27  ;;  %v1036_v46 = vmax.f32 %v1035_v42, 0.0  ;;  %v1057_v47 = vmax.f32 %v1056_v43, 0.0 }
 0x12a   : > { %994 = vst.msk [vmem:[#allocation5] sm:$0x7] %vm737_vm7, %v992_v48  ;;  %v870_v53 = vpop.xlane.xlu0 %869  ;;  %v1077_v48 = vsub.f32 1.0, %v1076_v44  ;;  %vm1092_vm7 = vcmp.eq.f32.partialorder %v1763_v9, inf }
 0x12b   : > { %v871_v54 = vsel %vm867_vm13, %v870_v53, 0.0 }
 0x12c   : > { %v872_v55 = vrot.slane %v871_v54, 4 }
 0x12e   : > { %v873_v56 = vadd.f32 %v872_v55, %v871_v54  ;;  %v1095_v54 = vand.u32 2147483648, %v1763_v9 }
 0x12f   : > { %v835_v49 = vpop.xlane.xlu1 %834 }
 0x130   : > { %v836_v39 = vadd.f32 %v835_v49, %v828_v30  ;;  %v874_v58 = vrot.slane %v873_v56, 2  ;;  %v1089_v30 = vsub.f32 1.5, %v1088_v41  ;;  %v1058_v49 = vadd.f32 %v1057_v47, %v1036_v46 }
 0x131   : > { %v1100_v50 = vld [vmem:[#allocation5] sm:$0x7] }
 0x132   : > { %838 = vst.msk [vmem:[#allocation2] sm:$0x1] %vm732_vm14, %v836_v39  ;;  %1103 = vperm.xlu0 %1452, %v1100_v50   ;;  %v875_v7 = vadd.f32 %v874_v58, %v873_v56  ;;  %v1078_v39 = vmax.f32 %v1077_v48, 0.0  ;;  %v1090_v50 = vmul.f32 %v1475_v19, %v1089_v30 }
 0x134   : > { %v876_v62 = vrot.slane %v875_v7, 1  ;;  %v1079_v52 = vadd.f32 %v1078_v39, %v1058_v49  ;;  %v1091_v53 = vmul.f32 %v1090_v50, %v1763_v9 }
 0x136   : > { %v877_v0 = vadd.f32 %v876_v62, %v875_v7  ;;  %v1412_v55 = vadd.f32 -1.0, %v1079_v52  ;;  %v1093_v56 = vsel %vm1092_vm7, %v1763_v9, %v1091_v53 }
 0x137   : > { %v1096_v7 = vsel %vm1094_vm10, %v1095_v54, %v1093_v56 }
 0x138   : > { %v878_v23 = vadd.f32 %v877_v0, %v866_v63 }
 0x139   : > { %v1010_v51 = vld [vmem:[#allocation2] sm:$0x1] }
 0x13a   : > { %1011 = vst.msk [vmem:[%s709_s14] sm:$0x1] %vm732_vm14, %v1010_v51  ;;  %v1098_v51 = vand.u32 127, %v744_v61 }
 0x13b   : > { %879 = vst.msk [vmem:[#allocation4] sm:$0x1] %vm732_vm14, %v878_v23 }
 0x13c   : > { %vm1107_vm8 = vcmp.eq.s32.totalorder %v1098_v51, 1  ;;  %vm1099_vm9 = vcmp.eq.s32.totalorder %v1098_v51, 0  ;;  %vm1116_vm11 = vcmp.eq.s32.totalorder %v1098_v51, 2  ;;  %vm1119_vm12 = vcmp.eq.s32.totalorder %v1098_v51, 3 }
 0x13d   : > { %v1117_v63 = vsel %vm1116_vm11, %v1412_v55, 0.0  ;;  %v1120_v8 = vsel %vm1119_vm12, %v1096_v7, 0.0 }
 0x142   : > { %v1014_v10 = vld [vmem:[#allocation4] sm:$0x1] }
 0x143   : > { %1015 = vst.msk [vmem:[%s720_s18] sm:$0x1] %vm732_vm14, %v1014_v10 }
 0x161   : > { %v1112_v45 = vpop.permute.xlu1 %1111 }
 0x162   : > { %v1114_v57 = vsel %vm1107_vm8, %v1112_v45, 0.0 }
 0x1a4   : > { %v1104_v58 = vpop.permute.xlu0 %1103 }
 0x1a5   : > { %v1106_v61 = vsel %vm1099_vm9, %v1104_v58, 0.0 }
 0x1a6   : > { %v1115_v62 = vadd.f32 %v1114_v57, %v1106_v61 }
 0x1a8   : > { %v1118_v0 = vadd.f32 %v1117_v63, %v1115_v62 }
 0x1aa   : > { %v1121_v59 = vadd.f32 %v1120_v8, %v1118_v0 }
 0x1ac   : > { %1122 = vst.msk [vmem:[%s726_s27] sm:$0x7] %vm1019_vm4, %v1121_v59 }
 0x1ad PF: > { %s23_s23 = sadd.s32 1, %s1498_s23   ;;  %s1830_s21 = smov %s1494_s22 }
 0x1ae   : > { %p20_p5 = scmp.ge.s32.totalorder %s23_s23, 4   ;;  %s1831_s22 = smov %s1833_s24 }
 0x1b0   :  { %22 = sbr.rel (!%p20_p5) target bundleno = 2 (0x2), region = 151 }

</bundles_post_ra>
